<compile_context>
chip_gen: v7x
topology: tpu7x:2x2x1
jax: 0.10.0
libtpu: 0.0.40
codegen_flags: <defaults>
</compile_context>

<pallas_src>
import functools

import jax
import jax.numpy as jnp
from jax.experimental import pallas as pl
from jax.experimental.pallas import tpu as pltpu


def _round_up(x: int, m: int) -> int:
    return ((x + m - 1) // m) * m


def small_phi_kernel(x_ref, w1_ref, b1_ref, w2t_ref, b2_ref, o_ref):
    # fc1 on the MXU with f32 accumulation; bias add + ReLU on the VPU.
    h = jnp.dot(x_ref[...], w1_ref[...], preferred_element_type=jnp.float32)
    h = jnp.maximum(h + b1_ref[...], 0.0)                      # [TB, H]
    # fc2 is K=10 / N=1: skip the MXU entirely.  VPU multiply against the
    # broadcast weight row + XLU cross-lane reduce, scalar bias from SMEM.
    out = jnp.sum(h * w2t_ref[...], axis=-1, keepdims=True) + b2_ref[0, 0]
    o_ref[...] = out.astype(o_ref.dtype)                       # [TB, 1]


@functools.partial(jax.jit, static_argnames=("block_b",))
def small_phi_forward(x, w1, b1, w2, b2, *, block_b: int = 512):
    """x: [B, D_in]; w1: [D_in, H]; b1: [1, H]; w2: [H, 1]; b2: [1, 1].

    Weights are the transposes of PyTorch nn.Linear weights ([out, in]).
    The fused kernel is specialized for output_size == 1 (SmallPhi default).
    """
    B, D_in = x.shape
    H = w1.shape[1]
    D_out = w2.shape[1]
    assert D_out == 1, "SmallPhi Pallas kernel is specialized for output_size == 1"

    # Sublane-aligned batch tile, capped at block_b; pad B so the grid divides.
    tb = min(block_b, _round_up(B, 8))
    b_pad = _round_up(B, tb)
    if b_pad != B:
        x = jnp.pad(x, ((0, b_pad - B), (0, 0)))

    w2t = w2.T.reshape(1, H)                       # [1, H], broadcasts over batch
    b2_s = b2.reshape(1, 1).astype(jnp.float32)    # scalar bias -> SMEM

    out = pl.pallas_call(
        small_phi_kernel,
        out_shape=jax.ShapeDtypeStruct((b_pad, 1), x.dtype),
        grid=(b_pad // tb,),
        in_specs=[
            pl.BlockSpec((tb, D_in), lambda i: (i, 0)),        # x rows for this tile
            pl.BlockSpec((D_in, H), lambda i: (0, 0)),         # w1 (VMEM-resident)
            pl.BlockSpec((1, H), lambda i: (0, 0)),            # b1
            pl.BlockSpec((1, H), lambda i: (0, 0)),            # w2 as a row
            pl.BlockSpec((1, 1), lambda i: (0, 0),
                         memory_space=pltpu.MemorySpace.SMEM),  # b2 scalar
        ],
        out_specs=pl.BlockSpec((tb, 1), lambda i: (i, 0)),
        compiler_params=pltpu.CompilerParams(
            dimension_semantics=("parallel",)),                 # megacore split on v7x
    )(x, w1, b1, w2t, b2_s)
    return out[:B]


def reference_forward(x, w1, b1, w2, b2):
    h = jnp.maximum(x @ w1 + b1, 0.0)
    return h @ w2 + b2


if __name__ == "__main__":
    # Shapes implied by SmallPhi(input_size=32, output_size=1, hidden_size=10).
    batch = 8
    input_size = 32
    hidden_size = 10
    output_size = 1

    key = jax.random.PRNGKey(0)
    kx, k1, k2, k3, k4, kx2 = jax.random.split(key, 6)

    x = jax.random.normal(kx, (batch, input_size), dtype=jnp.float32)
    w1 = jax.random.normal(k1, (input_size, hidden_size), dtype=jnp.float32) * 0.1
    b1 = jax.random.normal(k2, (1, hidden_size), dtype=jnp.float32) * 0.1
    w2 = jax.random.normal(k3, (hidden_size, output_size), dtype=jnp.float32) * 0.1
    b2 = jax.random.normal(k4, (1, output_size), dtype=jnp.float32) * 0.1

    # Small-batch case (single grid step).
    out = small_phi_forward(x, w1, b1, w2, b2)
    jax.block_until_ready(out)
    ref = reference_forward(x, w1, b1, w2, b2)
    assert out.shape == (batch, output_size), out.shape
    assert jnp.allclose(out, ref, atol=1e-5, rtol=1e-5), "mismatch vs reference (small B)"

    # Larger, non-multiple batch exercising the batch grid + padding path.
    big_b = 200
    x_big = jax.random.normal(kx2, (big_b, input_size), dtype=jnp.float32)
    out_big = small_phi_forward(x_big, w1, b1, w2, b2, block_b=64)  # grid=(4,)
    jax.block_until_ready(out_big)
    ref_big = reference_forward(x_big, w1, b1, w2, b2)
    assert out_big.shape == (big_b, output_size), out_big.shape
    assert jnp.allclose(out_big, ref_big, atol=1e-5, rtol=1e-5), "mismatch vs reference (tiled B)"

    print("KERNEL_OK")
</pallas_src>

<mosaic_0001>
module attributes {stable_mosaic.version = 11 : i64} {
  func.func @small_phi_kernel(%arg0: i32, %arg1: memref<8x32xf32, #tpu.memory_space<vmem>>, %arg2: memref<32x10xf32, #tpu.memory_space<vmem>>, %arg3: memref<1x10xf32, #tpu.memory_space<vmem>>, %arg4: memref<1x10xf32, #tpu.memory_space<vmem>>, %arg5: memref<1x1xf32, #tpu.memory_space<smem>>, %arg6: memref<8x1xf32, #tpu.memory_space<vmem>>) attributes {dimension_semantics = [#tpu.dimension_semantics<parallel>], iteration_bounds = array<i64: 1>, scalar_prefetch = 0 : i64, scratch_operands = 0 : i64, tpu.core_type = #tpu.core_type<tc>, window_params = [{transform_indices = @transform_0, window_bounds = array<i64: 8, 32>}, {pipeline_mode = #tpu.pipeline_mode<synchronous>, transform_indices = @transform_1, window_bounds = array<i64: 32, 10>}, {pipeline_mode = #tpu.pipeline_mode<synchronous>, transform_indices = @transform_2, window_bounds = array<i64: 1, 10>}, {pipeline_mode = #tpu.pipeline_mode<synchronous>, transform_indices = @transform_3, window_bounds = array<i64: 1, 10>}, {transform_indices = @transform_4, window_bounds = array<i64: 1, 1>}, {transform_indices = @transform_5, window_bounds = array<i64: 8, 1>}]} {
    %c0 = arith.constant 0 : index
    %c0_0 = arith.constant 0 : index
    %0 = vector.load %arg1[%c0, %c0_0] : memref<8x32xf32, #tpu.memory_space<vmem>>, vector<8x32xf32>
    %c0_1 = arith.constant 0 : index
    %c0_2 = arith.constant 0 : index
    %1 = vector.load %arg2[%c0_1, %c0_2] : memref<32x10xf32, #tpu.memory_space<vmem>>, vector<32x10xf32>
    %cst = arith.constant dense<0.000000e+00> : vector<8x10xf32>
    %2 = tpu.matmul %0, %1, %cst {dimension_numbers = #tpu.dot_dimension_numbers<[1], [0], [0], [1], [0, 0, 1, 1], [], []>} : vector<8x32xf32>, vector<32x10xf32>, vector<8x10xf32> -> vector<8x10xf32>
    %c0_3 = arith.constant 0 : index
    %c0_4 = arith.constant 0 : index
    %3 = vector.load %arg3[%c0_3, %c0_4] : memref<1x10xf32, #tpu.memory_space<vmem>>, vector<1x10xf32>
    %4 = vector.broadcast %3 : vector<1x10xf32> to vector<8x10xf32>
    %5 = arith.addf %2, %4 : vector<8x10xf32>
    %cst_5 = arith.constant 0.000000e+00 : f32
    %6 = vector.broadcast %cst_5 : f32 to vector<8x10xf32>
    %7 = arith.maximumf %5, %6 : vector<8x10xf32>
    %c0_6 = arith.constant 0 : index
    %c0_7 = arith.constant 0 : index
    %8 = vector.load %arg4[%c0_6, %c0_7] : memref<1x10xf32, #tpu.memory_space<vmem>>, vector<1x10xf32>
    %9 = vector.broadcast %8 : vector<1x10xf32> to vector<8x10xf32>
    %10 = arith.mulf %7, %9 : vector<8x10xf32>
    %cst_8 = arith.constant dense<0.000000e+00> : vector<8xf32>
    %11 = vector.multi_reduction <add>, %10, %cst_8 [1] : vector<8x10xf32> to vector<8xf32>
    %12 = vector.shape_cast %11 : vector<8xf32> to vector<8x1xf32>
    %c0_9 = arith.constant 0 : index
    %c0_10 = arith.constant 0 : index
    %13 = memref.load %arg5[%c0_9, %c0_10] : memref<1x1xf32, #tpu.memory_space<smem>>
    %14 = vector.broadcast %13 : f32 to vector<8x1xf32>
    %15 = arith.addf %12, %14 : vector<8x1xf32>
    %c0_11 = arith.constant 0 : index
    %c0_12 = arith.constant 0 : index
    %16 = vector.load %arg6[%c0_11, %c0_12] : memref<8x1xf32, #tpu.memory_space<vmem>>, vector<8x1xf32>
    tpu.vector_store %arg6[%c0_11, %c0_12], %15 {strides = array<i32>} : memref<8x1xf32, #tpu.memory_space<vmem>>, vector<8x1xf32>,
    return
  }
  func.func @transform_0(%arg0: i32) -> (i32, i32) {
    %c0_i32 = arith.constant 0 : i32
    %c0_i32_0 = arith.constant 0 : i32
    return %arg0, %c0_i32 : i32, i32
  }
  func.func @transform_1(%arg0: i32) -> (i32, i32) {
    %c0_i32 = arith.constant 0 : i32
    %c0_i32_0 = arith.constant 0 : i32
    %c0_i32_1 = arith.constant 0 : i32
    return %c0_i32, %c0_i32_0 : i32, i32
  }
  func.func @transform_2(%arg0: i32) -> (i32, i32) {
    %c0_i32 = arith.constant 0 : i32
    %c0_i32_0 = arith.constant 0 : i32
    %c0_i32_1 = arith.constant 0 : i32
    return %c0_i32, %c0_i32_0 : i32, i32
  }
  func.func @transform_3(%arg0: i32) -> (i32, i32) {
    %c0_i32 = arith.constant 0 : i32
    %c0_i32_0 = arith.constant 0 : i32
    %c0_i32_1 = arith.constant 0 : i32
    return %c0_i32, %c0_i32_0 : i32, i32
  }
  func.func @transform_4(%arg0: i32) -> (i32, i32) {
    %c0_i32 = arith.constant 0 : i32
    %c0_i32_0 = arith.constant 0 : i32
    %c0_i32_1 = arith.constant 0 : i32
    return %c0_i32, %c0_i32_0 : i32, i32
  }
  func.func @transform_5(%arg0: i32) -> (i32, i32) {
    %c0_i32 = arith.constant 0 : i32
    %c0_i32_0 = arith.constant 0 : i32
    return %arg0, %c0_i32 : i32, i32
  }
}

</mosaic_0001>

<bundles_post_ra>
// kernel: small_phi_forward.1
= control target key start
LH: loop header
LB: loop body
LE: loop exit
PB: predicated region body
PF: predicated region fallthrough
CT: control target
= control target key end

     0   :  { %v157_v0 = vmov 0.0|0.0   ;;  %vm158_vm0 = vmmov 0   ;;  %v159_v4 = vmov 0.0   ;;  %vm33_vm1 = vcmask 261120   ;;  %s217_s1 = inlined_call_operand.vmem [shape: f32[32,10], index: 1, kind: input, shape index: {}]   ;;  %s218_s0 = inlined_call_operand.vmem [shape: f32[8,32], index: 0, kind: input, shape index: {}]   ;;  %s219_s2 = inlined_call_operand.vmem [shape: f32[1,10], index: 2, kind: input, shape index: {}]   ;;  %s220_s3 = inlined_call_operand.vmem [shape: f32[1,10], index: 3, kind: input, shape index: {}]   ;;  %s221_s4 = inlined_call_operand.<no memory space> [shape: f32[1,1], index: 4, kind: input, shape index: {}]   ;;  %s222_s5 = inlined_call_operand.vmem [shape: f32[8,1], index: 5, kind: output, shape index: {}]  }
   0x1   :  { %148 = vmatprep.subr.bf16.mxu0 %v157_v0  ;;  %v22_v1 = vld [vmem:[%s217_s1] sm:$0xff]  ;;  %v23_v2 = vld [vmem:[%s217_s1 + $0x8] sm:$0xff]  ;;  %v24_v3 = vld [vmem:[%s217_s1 + $0x10] sm:$0xff]  ;;  %145 = vmatprep.mubr.msk.f32.mxu0 %vm158_vm0, %v159_v4  ;;  %vm116_vm2 = vcmask 80896   ;;  %v121_v17 = vstv %s221_s4  ;;  %vm123_vm3 = vcmask 7168  }
   0x2   :  { %v149_v5 = vpack.c.bf16 %v23_v2, %v22_v1  ;;  %v25_v6 = vld [vmem:[%s217_s1 + $0x18] sm:$0xff]  ;;  %v21_v8 = vld [vmem:[%s218_s0] sm:$0xff] }
   0x3   :  { %v152_v7 = vpack.c.bf16 %v25_v6, %v24_v3  ;;  %v129_v9 = vld [vmem:[%s219_s2] ss:$0 sm:$0xff] }
   0x4   :  { %150 = vmatpush3.bf16.msra.mxu0 %v149_v5  ;;  %v131_v13 = vld [vmem:[%s220_s3] ss:$0 sm:$0xff] }
   0x5   :  { %151 = vmatprep.subr.bf16.mxu0 %v157_v0 }
   0x8   :  { %153 = vmatpush3.bf16.msra.mxu0 %v152_v7 }
   0xb   :  { %146 = vmatmul.mubr.msk.f32.vlgmr.msra.gmra.mrb[0].mxu0 %vm33_vm1, %v21_v8 }
  0xde   :  { %v103_v10 = vpop.f32.mrb[0].mxu0 }
  0xdf   :  { %v104_v11 = vadd.f32 %v129_v9, %v103_v10  ;;  %v147_v12 = vpop.f32.mrb[1].mxu0 }
  0xe1   :  { %v107_v14 = vmax.f32 %v104_v11, 0.0 }
  0xe3   :  { %v115_v15 = vmul.f32 %v131_v13, %v107_v14 }
  0xe5   :  { %v117_v16 = vsel %vm116_vm2, %v115_v15, 0.0 }
  0xe6   :  { %118 = vadd.xlane.f32.xlu0 %v117_v16 }
 0x173   :  { %v119_v18 = vpop.xlane.xlu0 %118 }
 0x174   :  { %v122_v19 = vadd.f32 %v121_v17, %v119_v18 }
 0x176   :  { %124 = vst.msk [vmem:[%s222_s5] sm:$0xff] %vm123_vm3, %v122_v19 }

</bundles_post_ra>
